<compile_context>
chip_gen: v6e
topology: v6e:2x2x1
jax: 0.10.0
libtpu: 0.0.40
codegen_flags: <defaults>
</compile_context>

<pallas_src>
import functools
import math

import jax
import jax.numpy as jnp
from jax.experimental import pallas as pl
from jax.experimental.pallas import tpu as pltpu


def _bootstrap_ce_kernel(logits_ref, labels_ref, out_ref, *,
                         beta, eps, is_hard, n_rows, tile_n):
    """Per-tile partial (negated) bootstrap CE sum for one (tile_n, C) block."""
    x = logits_ref[...].astype(jnp.float32)          # (T, C) compute in f32
    labels = labels_ref[...]                         # (T, 1) int32

    # Numerically stable log-softmax pieces.
    m = jnp.max(x, axis=1, keepdims=True)            # (T, 1)
    shifted = x - m
    log_sum_e = jnp.log(jnp.sum(jnp.exp(shifted), axis=1, keepdims=True))

    # log of the clipped softmax probs: clip in log space (log is monotone).
    log_lo = math.log(eps)
    log_hi = math.log1p(-eps)
    logp = jnp.clip(shifted - log_sum_e, log_lo, log_hi)     # (T, C)

    col = jax.lax.broadcasted_iota(jnp.int32, x.shape, 1)

    if is_hard:
        # Label term: one masked full-width reduction.
        lab_sum = jnp.sum(jnp.where(col == labels, logp, 0.0),
                          axis=1, keepdims=True)             # (T, 1)
        # pred = one_hot(argmax(probs)): weighted log-prob is
        # log(clip(max prob)) = clip(-log_sum_e).
        pred_term = jnp.clip(-log_sum_e, log_lo, log_hi)     # (T, 1)
        row_loss = beta * lab_sum + (1.0 - beta) * pred_term
    else:
        # Fused single full-width reduction; exp(logp) == clip(p, eps, 1-eps).
        weight = jnp.where(col == labels, beta, 0.0) + (1.0 - beta) * jnp.exp(logp)
        row_loss = jnp.sum(weight * logp, axis=1, keepdims=True)  # (T, 1)

    # Mask ragged rows of the last tile (static no-op when tile_n divides N).
    if (n_rows % tile_n) != 0:
        row = jax.lax.broadcasted_iota(jnp.int32, row_loss.shape, 0)
        global_row = pl.program_id(0) * tile_n + row
        row_loss = jnp.where(global_row < n_rows, row_loss, 0.0)

    # Single per-tile partial sum -> one element written per grid step.
    total = jnp.sum(row_loss, axis=0, keepdims=True)          # (1, 1)
    out_ref[0] = -total


def _round_up(x, m):
    return (x + m - 1) // m * m


def _pick_tile_n(n, c, itemsize):
    # Sublane packing: 8 rows for f32, 16 for bf16, 32 for int8/fp8.
    sublane = max(8, 32 // max(1, itemsize))
    # ~4 MiB logits block: amortizes the ~0.35 us/step overhead on HBM-bound
    # v5e/v6e while 2x double-buffered blocks stay far under v7x's 64 MiB VMEM.
    budget = 4 * 1024 * 1024
    t = budget // max(1, c * itemsize)
    t = max(sublane, (t // sublane) * sublane)
    # Keep >= ~8 grid steps when N allows so the "parallel" grid axis can be
    # sharded across both v7x TensorCores.
    target = _round_up(-(-n // 8), sublane)
    t = min(t, max(sublane, target))
    # Tiny-batch case: use the full row extent (equal-to-array-dim blocks are
    # always legal, even when not a multiple of 8).
    if t > n:
        t = n
    return max(1, t)


def bootstrap_cross_entropy(logits, labels, beta=0.95, is_hard=0, eps=1e-6):
    """Pallas-TPU implementation of BootstrapCrossEntropy.forward (scalar mean)."""
    n, c = logits.shape
    labels = labels.astype(jnp.int32).reshape(n, 1)

    itemsize = jnp.dtype(logits.dtype).itemsize
    tile_n = _pick_tile_n(n, c, itemsize)
    num_tiles = -(-n // tile_n)

    partials = pl.pallas_call(
        functools.partial(
            _bootstrap_ce_kernel,
            beta=float(beta),
            eps=float(eps),
            is_hard=bool(is_hard),
            n_rows=n,
            tile_n=tile_n,
        ),
        out_shape=jax.ShapeDtypeStruct((num_tiles, 1, 1), jnp.float32),
        grid=(num_tiles,),
        in_specs=[
            pl.BlockSpec((tile_n, c), lambda i: (i, 0)),
            pl.BlockSpec((tile_n, 1), lambda i: (i, 0)),
        ],
        out_specs=pl.BlockSpec((1, 1, 1), lambda i: (i, 0, 0)),
        compiler_params=pltpu.CompilerParams(
            dimension_semantics=("parallel",),
        ),
    )(logits, labels)

    # Finish the tiny mean over num_tiles partial sums in the wrapper.
    return jnp.sum(partials) / n


def _reference(logits, labels, beta=0.95, is_hard=0, eps=1e-6):
    """Pure-JAX mirror of the PyTorch module."""
    num_classes = logits.shape[-1]
    oh = jax.nn.one_hot(labels, num_classes, dtype=jnp.float32)
    probs = jax.nn.softmax(logits.astype(jnp.float32), axis=-1)
    probs = jnp.clip(probs, eps, 1.0 - eps)
    if is_hard:
        pred = jax.nn.one_hot(jnp.argmax(probs, axis=-1), num_classes, dtype=jnp.float32)
    else:
        pred = probs
    loss = jnp.sum((beta * oh + (1.0 - beta) * pred) * jnp.log(probs), axis=-1)
    return jnp.mean(-loss)


if __name__ == "__main__":
    key = jax.random.PRNGKey(0)
    k1, k2 = jax.random.split(key)

    # Small shapes consistent with the module: batch=8 samples, 32 classes.
    N, C = 8, 32
    logits = jax.random.normal(k1, (N, C), dtype=jnp.float32)
    labels = jax.random.randint(k2, (N,), 0, C, dtype=jnp.int32)

    # Soft bootstrap (module default: beta=0.95, is_hard=0).
    out_soft = jax.block_until_ready(
        bootstrap_cross_entropy(logits, labels, beta=0.95, is_hard=0))
    ref_soft = _reference(logits, labels, beta=0.95, is_hard=0)
    assert jnp.allclose(out_soft, ref_soft, atol=1e-5, rtol=1e-5), (out_soft, ref_soft)

    # Hard bootstrap path.
    out_hard = jax.block_until_ready(
        bootstrap_cross_entropy(logits, labels, beta=0.95, is_hard=1))
    ref_hard = _reference(logits, labels, beta=0.95, is_hard=1)
    assert jnp.allclose(out_hard, ref_hard, atol=1e-5, rtol=1e-5), (out_hard, ref_hard)

    # Exercise the multi-tile + ragged-last-tile (in-kernel masked) path.
    k3, k4 = jax.random.split(k1)
    N2, C2 = 2000, 128
    logits2 = jax.random.normal(k3, (N2, C2), dtype=jnp.float32)
    labels2 = jax.random.randint(k4, (N2,), 0, C2, dtype=jnp.int32)
    out2 = jax.block_until_ready(bootstrap_cross_entropy(logits2, labels2))
    ref2 = _reference(logits2, labels2)
    assert jnp.allclose(out2, ref2, atol=1e-5, rtol=1e-5), (out2, ref2)

    out2h = jax.block_until_ready(bootstrap_cross_entropy(logits2, labels2, is_hard=1))
    ref2h = _reference(logits2, labels2, is_hard=1)
    assert jnp.allclose(out2h, ref2h, atol=1e-5, rtol=1e-5), (out2h, ref2h)

    print("KERNEL_OK")
</pallas_src>

<mosaic_0001>
module attributes {stable_mosaic.version = 11 : i64} {
  func.func @_bootstrap_ce_kernel(%arg0: i32, %arg1: memref<8x32xf32, #tpu.memory_space<vmem>>, %arg2: memref<8x1xi32, #tpu.memory_space<vmem>>, %arg3: memref<1x1x1xf32, #tpu.memory_space<vmem>>) attributes {dimension_semantics = [#tpu.dimension_semantics<parallel>], iteration_bounds = array<i64: 1>, scalar_prefetch = 0 : i64, scratch_operands = 0 : i64, tpu.core_type = #tpu.core_type<tc>, window_params = [{transform_indices = @transform_0, window_bounds = array<i64: 8, 32>}, {transform_indices = @transform_1, window_bounds = array<i64: 8, 1>}, {transform_indices = @transform_2, window_bounds = array<i64: 1, 1, 1>}]} {
    %c0 = arith.constant 0 : index
    %c0_0 = arith.constant 0 : index
    %0 = vector.load %arg1[%c0, %c0_0] : memref<8x32xf32, #tpu.memory_space<vmem>>, vector<8x32xf32>
    %c0_1 = arith.constant 0 : index
    %c0_2 = arith.constant 0 : index
    %1 = vector.load %arg2[%c0_1, %c0_2] : memref<8x1xi32, #tpu.memory_space<vmem>>, vector<8x1xi32>
    %cst = arith.constant dense<0xFF800000> : vector<8xf32>
    %2 = vector.multi_reduction <maximumf>, %0, %cst [1] : vector<8x32xf32> to vector<8xf32>
    %3 = vector.shape_cast %2 : vector<8xf32> to vector<8x1xf32>
    %4 = vector.broadcast %3 : vector<8x1xf32> to vector<8x32xf32>
    %5 = arith.subf %0, %4 : vector<8x32xf32>
    %6 = math.exp %5 : vector<8x32xf32>
    %cst_3 = arith.constant dense<0.000000e+00> : vector<8xf32>
    %7 = vector.multi_reduction <add>, %6, %cst_3 [1] : vector<8x32xf32> to vector<8xf32>
    %8 = vector.shape_cast %7 : vector<8xf32> to vector<8x1xf32>
    %9 = math.log %8 : vector<8x1xf32>
    %10 = vector.broadcast %9 : vector<8x1xf32> to vector<8x32xf32>
    %11 = arith.subf %5, %10 : vector<8x32xf32>
    %cst_4 = arith.constant -13.8155107 : f32
    %cst_5 = arith.constant -1.00000045E-6 : f32
    %12 = vector.broadcast %cst_4 : f32 to vector<8x32xf32>
    %13 = arith.maximumf %12, %11 : vector<8x32xf32>
    %14 = vector.broadcast %cst_5 : f32 to vector<8x32xf32>
    %15 = arith.minimumf %14, %13 : vector<8x32xf32>
    %16 = tpu.iota {dimensions = array<i32: 1>} : vector<8x32xi32>
    %17 = vector.broadcast %1 : vector<8x1xi32> to vector<8x32xi32>
    %18 = arith.cmpi eq, %16, %17 : vector<8x32xi32>
    %cst_6 = arith.constant 0.949999988 : f32
    %cst_7 = arith.constant 0.000000e+00 : f32
    %19 = vector.broadcast %cst_6 : f32 to vector<8x32xf32>
    %20 = vector.broadcast %cst_7 : f32 to vector<8x32xf32>
    %21 = arith.select %18, %19, %20 : vector<8x32xi1>, vector<8x32xf32>
    %22 = math.exp %15 : vector<8x32xf32>
    %cst_8 = arith.constant 5.000000e-02 : f32
    %23 = vector.broadcast %cst_8 : f32 to vector<8x32xf32>
    %24 = arith.mulf %23, %22 : vector<8x32xf32>
    %25 = arith.addf %21, %24 : vector<8x32xf32>
    %26 = arith.mulf %25, %15 : vector<8x32xf32>
    %cst_9 = arith.constant dense<0.000000e+00> : vector<8xf32>
    %27 = vector.multi_reduction <add>, %26, %cst_9 [1] : vector<8x32xf32> to vector<8xf32>
    %28 = vector.shape_cast %27 : vector<8xf32> to vector<8x1xf32>
    %cst_10 = arith.constant dense<0.000000e+00> : vector<1xf32>
    %29 = vector.multi_reduction <add>, %28, %cst_10 [0] : vector<8x1xf32> to vector<1xf32>
    %30 = vector.shape_cast %29 : vector<1xf32> to vector<1x1xf32>
    %cst_11 = arith.constant 0.000000e+00 : f32
    %31 = vector.broadcast %cst_11 : f32 to vector<1x1xf32>
    %32 = arith.subf %31, %30 : vector<1x1xf32>
    %c0_12 = arith.constant 0 : index
    %c0_13 = arith.constant 0 : index
    %c0_14 = arith.constant 0 : index
    %33 = vector.load %arg3[%c0_12, %c0_13, %c0_14] : memref<1x1x1xf32, #tpu.memory_space<vmem>>, vector<1x1x1xf32>
    %34 = vector.shape_cast %33 : vector<1x1x1xf32> to vector<1x1xf32>
    %35 = vector.shape_cast %32 : vector<1x1xf32> to vector<1x1x1xf32>
    tpu.vector_store %arg3[%c0_12, %c0_13, %c0_14], %35 {strides = array<i32>} : memref<1x1x1xf32, #tpu.memory_space<vmem>>, vector<1x1x1xf32>,
    return
  }
  func.func @transform_0(%arg0: i32) -> (i32, i32) {
    %c0_i32 = arith.constant 0 : i32
    %c0_i32_0 = arith.constant 0 : i32
    return %arg0, %c0_i32 : i32, i32
  }
  func.func @transform_1(%arg0: i32) -> (i32, i32) {
    %c0_i32 = arith.constant 0 : i32
    %c0_i32_0 = arith.constant 0 : i32
    return %arg0, %c0_i32 : i32, i32
  }
  func.func @transform_2(%arg0: i32) -> (i32, i32, i32) {
    %c0_i32 = arith.constant 0 : i32
    %c0_i32_0 = arith.constant 0 : i32
    %c0_i32_1 = arith.constant 0 : i32
    return %arg0, %c0_i32, %c0_i32_0 : i32, i32, i32
  }
}

</mosaic_0001>

<bundles_post_ra>
// kernel: tpu_custom_call.1
= control target key start
LH: loop header
LB: loop body
LE: loop exit
PB: predicated region body
PF: predicated region fallthrough
CT: control target
= control target key end

     0   :  { %vm14_vm0 = vcmask 261120   ;;  %s130_s0 = inlined_call_operand.vmem [shape: f32[8,32], index: 0, kind: input, shape index: {}]   ;;  %s131_s1 = inlined_call_operand.vmem [shape: s32[8,1], index: 1, kind: input, shape index: {}]   ;;  %s132_s2 = inlined_call_operand.hbm [shape: f32[1,1,1], index: 2, kind: output, shape index: {}]  }
   0x1   :  { %v12_v0 = vld [vmem:[%s130_s0] sm:$0xff] }
   0x2   :  { %7 = vsyncpa [#allocation3], 0  ;;  %v15_v1 = vsel %vm14_vm0, %v12_v0, -inf  ;;  %v13_v2 = vld [vmem:[%s131_s1] sm:$0xff]  ;;  %v100_v3 = vmov 0   ;;  %v29_v16 = vlaneseq  ;;  %v101_v20 = vmov 0.0  }
   0x3   :  { %16 = vmax.xlane.f32.xlu0 %v15_v1  ;;  %70 = vset.pattern.permute.xlu1 %v100_v3  ;;  %s102_s0 = smov [#allocation2]   ;;  %vm51_vm2 = vcmask 0  }
   0x4   :  { %71 = vset.pattern.permute.xlu0 %v100_v3  ;;  %32 = vperm.xlu1 %70, %v13_v2   ;;  %v30_v17 = vand.u32 127, %v29_v16  ;;  %s59_s1 = sshll.u32 %s102_s0, 4  ;;  %s60_s1 = int_to_ptr.vmem [resolvable:$true] %s59_s1 }
   0x5   :  { %s78_s13 = scalar_lea.vmem %s60_s1, 16  ;;  %s82_s14 = scalar_lea.vmem %s60_s1, 32 }
   0x6   :  { %p79_p0 = scmp.ne.s32.totalorder %s60_s1, %s78_s13  ;;  %p83_p1 = scmp.lt.s32.totalorder %s60_s1, %s60_s1 }
   0x7   :  { %p84_p2 = scmp.lt.s32.totalorder %s82_s14, %s78_s13 }
   0x9   :  { %p85_p3 = por %p84_p2, %p83_p1 }
   0xb   :  { %p86_p4 = pnand %p85_p3, %p79_p0 }
  0x7f   :  { %v33_v18 = vpop.permute.xlu1 %32 }
  0x80   :  { %vm34_vm1 = vcmp.eq.s32.totalorder %v30_v17, %v33_v18 }
  0x81   :  { %v35_v21 = vsel %vm34_vm1, 0.95, %v101_v20 }
  0x8c   :  { %v17_v4 = vpop.xlane.xlu0 %16 }
  0x8d   :  { %v18_v5 = vsub.f32 %v12_v0, %v17_v4 }
  0x8f   :  { %v19_v6 = vmul.f32 1.442695, %v18_v5 }
  0x91   :  { %72 = vpow2.f32 %v19_v6 }
  0x9e   :  { %v73_v7 = vpop.eup %72 }
  0x9f   :  { %v21_v8 = vsel %vm14_vm0, %v73_v7, 0.0 }
  0xa0   :  { %22 = vadd.xlane.f32.xlu0 %v21_v8 }
 0x129   :  { %v23_v9 = vpop.xlane.xlu0 %22 }
 0x12a   :  { %74 = vlog2.f32 %v23_v9 }
 0x137   :  { %v75_v10 = vpop.eup %74 }
 0x138   :  { %v25_v11 = vmul.f32 0.6931472, %v75_v10 }
 0x13a   :  { %v26_v12 = vsub.f32 %v18_v5, %v25_v11 }
 0x13c   :  { %v27_v13 = vmax.f32 %v26_v12, -13.815511 }
 0x13e   :  { %v28_v14 = vmin.f32 %v27_v13, -1.0000005e-06 }
 0x140   :  { %v36_v15 = vmul.f32 1.442695, %v28_v14 }
 0x142   :  { %76 = vpow2.f32 %v36_v15 }
 0x14f   :  { %v77_v19 = vpop.eup %76 }
 0x150   :  { %v38_v22 = vmul.f32 0.05, %v77_v19 }
 0x152   :  { %v39_v23 = vadd.f32 %v38_v22, %v35_v21 }
 0x154   :  { %v40_v24 = vmul.f32 %v39_v23, %v28_v14 }
 0x156   :  { %v41_v25 = vsel %vm14_vm0, %v40_v24, 0.0 }
 0x157   :  { %42 = vadd.xlane.f32.xlu1 %v41_v25 }
 0x1e0   :  { %v43_v26 = vpop.xlane.xlu1 %42 }
 0x1e1   :  { %v44_v27 = vrot.slane %v43_v26, 4 }
 0x1e3   :  { %v45_v28 = vadd.f32 %v44_v27, %v43_v26 }
 0x1e5   :  { %v46_v29 = vrot.slane %v45_v28, 2 }
 0x1e7   :  { %v47_v30 = vadd.f32 %v46_v29, %v45_v28 }
 0x1e9   :  { %v48_v31 = vrot.slane %v47_v30, 1 }
 0x1eb   :  { %v49_v32 = vadd.f32 %v48_v31, %v47_v30 }
 0x1ed   :  { %v50_v33 = vsub.f32 0.0, %v49_v32 }
 0x1ef   :  { %52 = vst.msk [vmem:[#allocation2] sm:$0x1] %vm51_vm2, %v50_v33 }
 0x1f0   :  { %89 = shalt.err (!%p86_p4)
}
 0x1f1   :  { %62 = dma.vmem_to_hbm [thread:$0]  %s60_s1, 16, %s132_s2, [#allocation3]  }
 0x1f2   :  { %98 = dma.done.wait [#allocation3], 16  }
 0x1f3   :  { %99 = vsyncadd [#allocation3], 4294967280 }
 0x1f4   :  { %66 = vsyncpa [#allocation3], 1 }

</bundles_post_ra>
